<compile_context>
chip_gen: v6e
topology: v6e:2x2x1
jax: 0.10.0
libtpu: 0.0.40
codegen_flags: <defaults>
</compile_context>

<pallas_src>
import jax
import jax.numpy as jnp
from jax import lax
from jax.experimental import pallas as pl
from jax.experimental.pallas import tpu as pltpu


# ----------------------------- Pallas kernel -------------------------------
def _dynconv_kernel(patch_ref, w_ref, att_ref, out_ref):
    # patch_ref: (1, CKK, TP)   bf16  im2col patches, positions on the lane axis
    # w_ref:     (NB*O, CKK)    bf16  all basis kernels (resident, fetched once)
    # att_ref:   (1, NB, TP)    f32   per-basis attention, repeated over W
    # out_ref:   (1, O, TP)     out dtype (lane-dense store)
    n_basis = att_ref.shape[1]
    o_planes = out_ref.shape[1]

    # Single MXU call produces every basis output at once: (NB*O,CKK)@(CKK,TP).
    contrib = jnp.dot(w_ref[...], patch_ref[0],
                      preferred_element_type=jnp.float32)          # (NB*O, TP)

    att = att_ref[0]                                               # (NB, TP)
    # Attention-weighted sum over the basis axis: NB static sublane slices,
    # pure VPU work (no cross-lane movement, no grid-level accumulator).
    acc = contrib[0:o_planes, :] * att[0:1, :]
    for nb in range(1, n_basis):
        acc = acc + contrib[nb * o_planes:(nb + 1) * o_planes, :] * att[nb:nb + 1, :]

    out_ref[0] = acc.astype(out_ref.dtype)


# ------------------------------- JAX glue -----------------------------------
def _im2col_T(x, k, stride, pad):
    """x: (B, C, H, W) -> (B, C*k*k, Ho*Wo), row order (c, kh, kw)."""
    B, C, H, W = x.shape
    xp = jnp.pad(x, ((0, 0), (0, 0), (pad, pad), (pad, pad)))
    Ho = (H + 2 * pad - k) // stride + 1
    Wo = (W + 2 * pad - k) // stride + 1
    cols = []
    for i in range(k):
        for j in range(k):
            cols.append(xp[:, :, i:i + stride * Ho:stride, j:j + stride * Wo:stride])
    p = jnp.stack(cols, axis=2)                       # (B, C, k*k, Ho, Wo)
    return p.reshape(B, C * k * k, Ho * Wo), Ho, Wo


def _conv1d(x, w, stride, pad):
    """x: (B, C, L), w: (Co, C, k) -> (B, Co, Lo)."""
    B, C, L = x.shape
    Co, _, k = w.shape
    xp = jnp.pad(x, ((0, 0), (0, 0), (pad, pad)))
    Lo = (L + 2 * pad - k) // stride + 1
    cols = [xp[:, :, i:i + stride * Lo:stride] for i in range(k)]
    p = jnp.stack(cols, axis=2).reshape(B, C * k, Lo)   # flatten order (c, k)
    return jnp.einsum('bkl,ok->bol', p, w.reshape(Co, C * k))


def _attention_freq(x, params, k, stride, temperature):
    """attention2d with pool_dim='freq'. Returns (B, NB, Ho)."""
    xm = jnp.mean(x, axis=3)                             # mean over W -> (B, C, H)
    pad = (k - 1) // 2
    y = _conv1d(xm, params['att_w1'], stride, pad)       # (B, hidden, L)
    # BatchNorm1d of a freshly-constructed module => train mode: batch stats,
    # biased variance, eps=1e-5, gamma=1, beta=0.
    mean = jnp.mean(y, axis=(0, 2), keepdims=True)
    var = jnp.mean((y - mean) ** 2, axis=(0, 2), keepdims=True)
    y = (y - mean) / jnp.sqrt(var + 1e-5)
    y = y * params['bn_gamma'][None, :, None] + params['bn_beta'][None, :, None]
    y = jnp.maximum(y, 0.0)
    att = (jnp.einsum('bcl,nc->bnl', y, params['att_w2'][:, :, 0])
           + params['att_b2'][None, :, None])
    return jax.nn.softmax(att / temperature, axis=1)     # softmax over basis dim


def _choose_p_tile(P):
    """Largest lane-aligned (multiple of 128) divisor of P up to 4096 rows."""
    if P <= 512 or P % 128 != 0:
        return P                      # block == full extent (always legal)
    best = 128
    for cand in range(128, min(P, 4096) + 1, 128):
        if P % cand == 0:
            best = cand
    return best


def dynamic_conv2d(x, params, *, kernel_size, stride, padding,
                   n_basis_kernels, temperature, pool_dim='freq'):
    assert pool_dim == 'freq'  # TODO(synk): 'time'/'both' attention variants not wired up
    B, C, H, W = x.shape
    NB = n_basis_kernels
    weight = params['weight']                            # (NB, O, C, k, k)
    O = weight.shape[1]
    k = kernel_size

    patches_T, Ho, Wo = _im2col_T(x, k, stride, padding)  # (B, CKK, P)
    P = Ho * Wo
    CKK = C * k * k

    # All basis kernels flattened into one GEMM lhs; row index = nb*O + o
    # (matches PyTorch's aggregate_weight.view(-1, C, k, k) flatten order).
    w2d = weight.reshape(NB * O, CKK).astype(jnp.bfloat16)
    patches_T = patches_T.astype(jnp.bfloat16)

    att = _attention_freq(x, params, k, stride, temperature)      # (B, NB, Ho)
    assert att.shape[-1] == Ho  # mirrors the PyTorch shape assert (freq pooling)
    att_rep = jnp.broadcast_to(att[:, :, :, None],
                               (B, NB, Ho, Wo)).reshape(B, NB, P)
    att_rep = att_rep.astype(jnp.float32)

    TP = _choose_p_tile(P)
    n_pt = max(P // TP, 1)

    out = pl.pallas_call(
        _dynconv_kernel,
        out_shape=jax.ShapeDtypeStruct((B, O, P), x.dtype),
        grid_spec=pltpu.PrefetchScalarGridSpec(
            num_scalar_prefetch=0,
            grid=(B, n_pt),
            in_specs=[
                pl.BlockSpec((1, CKK, TP), lambda b, pt: (b, 0, pt)),
                pl.BlockSpec((NB * O, CKK), lambda b, pt: (0, 0)),   # resident
                pl.BlockSpec((1, NB, TP), lambda b, pt: (b, 0, pt)),
            ],
            out_specs=pl.BlockSpec((1, O, TP), lambda b, pt: (b, 0, pt)),
        ),
        compiler_params=pltpu.CompilerParams(
            dimension_semantics=("parallel", "parallel"),
            vmem_limit_bytes=32 * 1024 * 1024),
    )(patches_T, w2d, att_rep)

    # (B, O, P) is already NCHW after a reshape.
    return out.reshape(B, O, Ho, Wo)


# -------------------------- deterministic params ----------------------------
def init_params(key, in_planes, out_planes, kernel_size, n_basis_kernels, reduction):
    hidden = max(in_planes // reduction, 4)
    k = kernel_size
    k0, k1, k2 = jax.random.split(key, 3)
    # self.weight[i]: kaiming_normal_ (fan_in, gain sqrt(2))
    fan_in = in_planes * k * k
    w = jax.random.normal(k0, (n_basis_kernels, out_planes, in_planes, k, k),
                          jnp.float32) * (2.0 / fan_in) ** 0.5
    # conv1d1: kaiming_normal_ mode='fan_out', relu -> fan_out = hidden * k
    w1 = jax.random.normal(k1, (hidden, in_planes, k), jnp.float32) \
        * (2.0 / (hidden * k)) ** 0.5
    # conv1d2: fan_out = n_basis_kernels * 1 ; bias = 0
    w2 = jax.random.normal(k2, (n_basis_kernels, hidden, 1), jnp.float32) \
        * (2.0 / n_basis_kernels) ** 0.5
    return dict(weight=w,
                att_w1=w1,
                att_w2=w2,
                att_b2=jnp.zeros((n_basis_kernels,), jnp.float32),
                bn_gamma=jnp.ones((hidden,), jnp.float32),
                bn_beta=jnp.zeros((hidden,), jnp.float32))


# ------------------------------- reference ----------------------------------
def reference(x, params, *, kernel_size, stride, padding, n_basis_kernels, temperature):
    weight = params['weight']
    NB, O, C, k, _ = weight.shape
    agg_w = weight.reshape(NB * O, C, k, k)
    out = lax.conv_general_dilated(
        x, agg_w, (stride, stride), [(padding, padding), (padding, padding)],
        dimension_numbers=('NCHW', 'OIHW', 'NCHW'))
    B, Ho, Wo = x.shape[0], out.shape[2], out.shape[3]
    out = out.reshape(B, NB, O, Ho, Wo)
    att = _attention_freq(x, params, k, stride, temperature)   # (B, NB, Ho)
    att = att[:, :, None, :, None]                              # (B, NB, 1, Ho, 1)
    return jnp.sum(out * att, axis=1)


if __name__ == "__main__":
    key = jax.random.PRNGKey(0)
    kx, kp = jax.random.split(key)

    B, C, O, H, W = 2, 4, 8, 16, 16
    k, stride, padding = 3, 1, 1
    NB, temperature, reduction = 4, 31.0, 4

    x = jax.random.normal(kx, (B, C, H, W), jnp.float32)
    params = init_params(kp, C, O, k, NB, reduction)

    out = dynamic_conv2d(x, params, kernel_size=k, stride=stride, padding=padding,
                         n_basis_kernels=NB, temperature=temperature,
                         pool_dim='freq')
    out = jax.block_until_ready(out)

    ref = jax.block_until_ready(
        reference(x, params, kernel_size=k, stride=stride, padding=padding,
                  n_basis_kernels=NB, temperature=temperature))

    assert out.shape == (B, O, H, W), out.shape
    if bool(jnp.allclose(out, ref, rtol=5e-2, atol=5e-2)):
        print("KERNEL_OK")
    else:
        print("MISMATCH max_abs_err =", float(jnp.max(jnp.abs(out - ref))))
</pallas_src>

<mosaic_0001>
module attributes {stable_mosaic.version = 11 : i64} {
  func.func @_dynconv_kernel(%arg0: i32, %arg1: i32, %arg2: memref<1x36x256xbf16, #tpu.memory_space<vmem>>, %arg3: memref<32x36xbf16, #tpu.memory_space<vmem>>, %arg4: memref<1x4x256xf32, #tpu.memory_space<vmem>>, %arg5: memref<1x8x256xf32, #tpu.memory_space<vmem>>) attributes {dimension_semantics = [#tpu.dimension_semantics<parallel>, #tpu.dimension_semantics<parallel>], iteration_bounds = array<i64: 2, 1>, scalar_prefetch = 0 : i64, scratch_operands = 0 : i64, tpu.core_type = #tpu.core_type<tc>, window_params = [{transform_indices = @transform_0, window_bounds = array<i64: 1, 36, 256>}, {pipeline_mode = #tpu.pipeline_mode<synchronous>, transform_indices = @transform_1, window_bounds = array<i64: 32, 36>}, {transform_indices = @transform_2, window_bounds = array<i64: 1, 4, 256>}, {transform_indices = @transform_3, window_bounds = array<i64: 1, 8, 256>}]} {
    %c0 = arith.constant 0 : index
    %c0_0 = arith.constant 0 : index
    %0 = vector.load %arg3[%c0, %c0_0] : memref<32x36xbf16, #tpu.memory_space<vmem>>, vector<32x36xbf16>
    %c0_1 = arith.constant 0 : index
    %c0_2 = arith.constant 0 : index
    %c0_3 = arith.constant 0 : index
    %1 = vector.load %arg2[%c0_1, %c0_2, %c0_3] : memref<1x36x256xbf16, #tpu.memory_space<vmem>>, vector<1x36x256xbf16>
    %2 = vector.shape_cast %1 : vector<1x36x256xbf16> to vector<36x256xbf16>
    %cst = arith.constant dense<0.000000e+00> : vector<32x256xf32>
    %3 = tpu.matmul %0, %2, %cst {dimension_numbers = #tpu.dot_dimension_numbers<[1], [0], [0], [1], [0, 0, 1, 1], [], []>} : vector<32x36xbf16>, vector<36x256xbf16>, vector<32x256xf32> -> vector<32x256xf32>
    %c0_4 = arith.constant 0 : index
    %c0_5 = arith.constant 0 : index
    %c0_6 = arith.constant 0 : index
    %4 = vector.load %arg4[%c0_4, %c0_5, %c0_6] : memref<1x4x256xf32, #tpu.memory_space<vmem>>, vector<1x4x256xf32>
    %5 = vector.shape_cast %4 : vector<1x4x256xf32> to vector<4x256xf32>
    %6 = vector.extract_strided_slice %3 {offsets = [0, 0], sizes = [8, 256], strides = [1, 1]} : vector<32x256xf32> to vector<8x256xf32>
    %7 = vector.extract_strided_slice %5 {offsets = [0, 0], sizes = [1, 256], strides = [1, 1]} : vector<4x256xf32> to vector<1x256xf32>
    %8 = vector.broadcast %7 : vector<1x256xf32> to vector<8x256xf32>
    %9 = arith.mulf %6, %8 : vector<8x256xf32>
    %10 = vector.extract_strided_slice %3 {offsets = [8, 0], sizes = [8, 256], strides = [1, 1]} : vector<32x256xf32> to vector<8x256xf32>
    %11 = vector.extract_strided_slice %5 {offsets = [1, 0], sizes = [1, 256], strides = [1, 1]} : vector<4x256xf32> to vector<1x256xf32>
    %12 = vector.broadcast %11 : vector<1x256xf32> to vector<8x256xf32>
    %13 = arith.mulf %10, %12 : vector<8x256xf32>
    %14 = arith.addf %9, %13 : vector<8x256xf32>
    %15 = vector.extract_strided_slice %3 {offsets = [16, 0], sizes = [8, 256], strides = [1, 1]} : vector<32x256xf32> to vector<8x256xf32>
    %16 = vector.extract_strided_slice %5 {offsets = [2, 0], sizes = [1, 256], strides = [1, 1]} : vector<4x256xf32> to vector<1x256xf32>
    %17 = vector.broadcast %16 : vector<1x256xf32> to vector<8x256xf32>
    %18 = arith.mulf %15, %17 : vector<8x256xf32>
    %19 = arith.addf %14, %18 : vector<8x256xf32>
    %20 = vector.extract_strided_slice %3 {offsets = [24, 0], sizes = [8, 256], strides = [1, 1]} : vector<32x256xf32> to vector<8x256xf32>
    %21 = vector.extract_strided_slice %5 {offsets = [3, 0], sizes = [1, 256], strides = [1, 1]} : vector<4x256xf32> to vector<1x256xf32>
    %22 = vector.broadcast %21 : vector<1x256xf32> to vector<8x256xf32>
    %23 = arith.mulf %20, %22 : vector<8x256xf32>
    %24 = arith.addf %19, %23 : vector<8x256xf32>
    %c0_7 = arith.constant 0 : index
    %c0_8 = arith.constant 0 : index
    %c0_9 = arith.constant 0 : index
    %25 = vector.load %arg5[%c0_7, %c0_8, %c0_9] : memref<1x8x256xf32, #tpu.memory_space<vmem>>, vector<1x8x256xf32>
    %26 = vector.shape_cast %25 : vector<1x8x256xf32> to vector<8x256xf32>
    %27 = vector.shape_cast %24 : vector<8x256xf32> to vector<1x8x256xf32>
    tpu.vector_store %arg5[%c0_7, %c0_8, %c0_9], %27 {strides = array<i32>} : memref<1x8x256xf32, #tpu.memory_space<vmem>>, vector<1x8x256xf32>,
    return
  }
  func.func @transform_0(%arg0: i32, %arg1: i32) -> (i32, i32, i32) {
    %c0_i32 = arith.constant 0 : i32
    %c0_i32_0 = arith.constant 0 : i32
    return %arg0, %c0_i32, %arg1 : i32, i32, i32
  }
  func.func @transform_1(%arg0: i32, %arg1: i32) -> (i32, i32) {
    %c0_i32 = arith.constant 0 : i32
    %c0_i32_0 = arith.constant 0 : i32
    %c0_i32_1 = arith.constant 0 : i32
    return %c0_i32, %c0_i32_0 : i32, i32
  }
  func.func @transform_2(%arg0: i32, %arg1: i32) -> (i32, i32, i32) {
    %c0_i32 = arith.constant 0 : i32
    %c0_i32_0 = arith.constant 0 : i32
    return %arg0, %c0_i32, %arg1 : i32, i32, i32
  }
  func.func @transform_3(%arg0: i32, %arg1: i32) -> (i32, i32, i32) {
    %c0_i32 = arith.constant 0 : i32
    %c0_i32_0 = arith.constant 0 : i32
    return %arg0, %c0_i32, %arg1 : i32, i32, i32
  }
}

</mosaic_0001>

<bundles_post_ra>
// kernel: tpu_custom_call.1
= control target key start
LH: loop header
LB: loop body
LE: loop exit
PB: predicated region body
PF: predicated region fallthrough
CT: control target
= control target key end

     0   :  { %8 = vsyncpa [#allocation3], 0  ;;  %s865_s0 = inlined_call_operand.vmem [shape: bf16[2,36,256], index: 0, kind: input, shape index: {}]   ;;  %s866_s1 = inlined_call_operand.vmem [shape: bf16[32,36], index: 1, kind: input, shape index: {}]   ;;  %s867_s2 = inlined_call_operand.vmem [shape: f32[2,4,256], index: 2, kind: input, shape index: {}]   ;;  %s868_s3 = inlined_call_operand.hbm [shape: f32[2,8,256], index: 3, kind: output, shape index: {}]  }
   0x1   :  { %10 = vsyncpa [#allocation3 + $0x1], 0  ;;  %s749_s12 = smov 0   ;;  %s751_s13 = smov 0  }
   0x2   :  { %s753_s14 = smov 0   ;;  %s755_s15 = smov 0  }
   0x3   :  { %s757_s16 = smov 0   ;;  %s759_s17 = smov 0  }
   0x4 LB: > { %s549_s18 = sadd.s32 4294967295, %s725_s17   ;;  %s550_s19 = sadd.s32 4294967294, %s725_s17   ;;  %s725_s17 = sphi %s759_s17, %s16_s17   ;;  %s721_s16 = sphi %s757_s16, %s875_s16   ;;  %s717_s15 = sphi %s755_s15, %s874_s15   ;;  %s713_s14 = sphi %s753_s14, %s873_s14   ;;  %s709_s13 = sphi %s751_s13, %s872_s13   ;;  %s705_s12 = sphi %s749_s12, %s871_s12  }
   0x5   : > { %s28_s20 = sadd.s32 1, %s721_s16  ;;  %s114_s21 = sadd.s32 1, %s713_s14 }
   0x6   : > { %p30_p0 = scmp.ge.s32.totalorder %s28_s20, 2  ;;  %p124_p1 = scmp.ne.s32.totalorder %s713_s14, %s709_s13 }
   0x7   : > { %p125_p2 = scmp.eq.s32.totalorder %s549_s18, 1  ;;  %p130_p3 = scmp.ne.s32.totalorder %s709_s13, %s705_s12 }
   0x8   : > { %s877_s20 = smov (%p30_p0, %s28_s20), 0  ;;  %p131_p5 = scmp.eq.s32.totalorder %s550_s19, 1 }
   0x9   : > { %p789_p4 = por %p125_p2, %p124_p1  ;;  %s109_s23 = ssub.s32 %s721_s16, %s877_s20 }
   0xa   : > { %p553_p6 = scmp.ge.s32.totalorder %s725_s17, 1  ;;  %p112_p7 = scmp.eq.s32.totalorder %s109_s23, 0 }
   0xb   : > { %p796_p8 = por %p131_p5, %p130_p3  ;;  %p178_p9 = scmp.lt.s32.totalorder %s725_s17, 3 }
   0xc   : > { %s802_s25 = scalar_select %p112_p7, %s713_s14, %s114_s21  }
   0xd   : > { %p179_p10 = pnand %p553_p6, %p178_p9 }
   0xe   : > { %p216_p11 = scmp.lt.s32.totalorder (!%p179_p10), %s717_s15, 1  ;;  %s212_s18 = sand.u32 (!%p179_p10), 1, %s709_s13  }
   0xf   : > { %182 = sbr.rel (%p179_p10) target bundleno = 260 (0x104), region = 32  ;;  %s554_s19 = sshll.u32 (!%p179_p10), %s212_s18, 4 }
  0x10   : > { %s575_s21 = sshll.u32 (!%p179_p10), %s717_s15, 8  ;;  %s214_s23 = scalar_lea.vmem (!%p179_p10), [#allocation2], %s554_s19 }
  0x11   : > { %s453_s29 = scalar_lea.hbm (!%p179_p10), %s868_s3, %s575_s21 }
  0x14   : > { %v727_v0 = vmov 0   ;;  %s806_s26 = scalar_select %p216_p11, %s717_s15, 1  ;;  %vm288_vm0 = vcmask 1041408   ;;  %v647_v9 = vld [vmem:[%s866_s1] sm:$0xff]   ;;  %v648_v10 = vld [vmem:[%s866_s1 + $0x8] sm:$0xff]   ;;  %vm281_vm1 = vcmask 293888   ;;  %v350_v11 = vlaneseq }
  0x15   : > { %327 = vmatprep.mubr.bf16.mxu0 %v727_v0  ;;  %337 = vmatprep.mubr.bf16.mxu1 %v727_v0  ;;  %s728_s15 = smov [#allocation2]  }
  0x16   : > { %s582_s27 = smul.u32 40, %s806_s26  ;;  %s574_s8 = sshll.u32 %s806_s26, 3  ;;  %v351_v12 = vshrl.u32 %v350_v11, 7 }
  0x17   : > { %s233_s11 = scalar_lea.vmem %s867_s2, %s574_s8  ;;  %s455_s26 = sshll.u32 %s214_s23, 4  ;;  %s456_s26 = int_to_ptr.vmem [resolvable:$true] %s455_s26 }
  0x18   : > { %s223_s30 = scalar_lea.vmem %s865_s0, %s582_s27  ;;  %v352_v13 = vsub.s32 0, %v351_v12  ;;  %v372_v14 = vsub.s32 1, %v351_v12  ;;  %v348_v15 = vld [vmem:[%s233_s11] sm:$0xff]  ;;  %v394_v16 = vsub.s32 2, %v351_v12  ;;  %v356_v17 = vsub.s32 4, %v351_v12  ;;  %s649_s4 = scalar_lea.vmem %s456_s26, 256 }
  0x19   : > { %v245_v1 = vld [vmem:[%s223_s30 + $0x20] sm:$0x33]  ;;  %v641_v4 = vld [vmem:[%s223_s30 + $0x14] ss:$8 sps:$4 sm:$0xff]   ;;  %v643_v6 = vld [vmem:[%s223_s30 + $0x10] ss:$8 sps:$4 sm:$0xff]   ;;  %p650_p12 = scmp.ne.s32.totalorder %s456_s26, %s649_s4 }
  0x1a   : > { %v565_v2 = vcombine.high %v245_v1, %v245_v1  ;;  %v564_v3 = vcombine.low %v245_v1, %v245_v1  ;;  %v644_v7 = vld [vmem:[%s223_s30 + $0x4] ss:$8 sps:$4 sm:$0xff]   ;;  %v646_v8 = vld [vmem:[%s223_s30] ss:$8 sps:$4 sm:$0xff]   ;;  %v376_v18 = vsub.s32 5, %v351_v12  ;;  %v353_v19 = vrot.slane %v348_v15, %v352_v13  ;;  %s439_s30 = scalar_lea.sflag [#allocation3], %s212_s18 }
  0x1b   : > { %v398_v20 = vsub.s32 6, %v351_v12  ;;  %v373_v21 = vrot.slane %v348_v15, %v372_v14  ;;  %v416_v22 = vsub.s32 3, %v351_v12  ;;  %v420_v23 = vsub.s32 7, %v351_v12  ;;  %p651_p13 = pnand %p650_p12, %p789_p4  ;;  %s653_s5 = sshll.u32 %s728_s15, 4  ;;  %s654_s5 = int_to_ptr.vmem [resolvable:$false] %s653_s5 }
  0x1c   : > { %566 = vmatprep.subr.msk.bf16.mxu0 %vm288_vm0, %v565_v2  ;;  %576 = vmatprep.subr.msk.bf16.mxu1 %vm288_vm0, %v565_v2  ;;  %v290_v5 = vsel %vm288_vm0, %v564_v3, 0  ;;  %v395_v24 = vrot.slane %v348_v15, %v394_v16  ;;  %v357_v25 = vrot.slane %v348_v15, %v356_v17  ;;  %v377_v26 = vrot.slane %v348_v15, %v376_v18  ;;  %s655_s6 = scalar_lea.vmem %s654_s5, 512  ;;  %p656_p1 = scmp.lt.s32.totalorder %s456_s26, %s654_s5 }
  0x1d   : > { %306 = vmatpush1.bf16.msra.mxu0 %v290_v5  ;;  %579 = vmatpush1.bf16.msra.mxu1 %v290_v5  ;;  %v363_v29 = vrot.slane %v353_v19, %v352_v13  ;;  %v399_v30 = vrot.slane %v348_v15, %v398_v20  ;;  %v383_v31 = vrot.slane %v373_v21, %v372_v14  ;;  %p652_p0 = pneg %p651_p13  ;;  %p657_p2 = scmp.lt.s32.totalorder %s655_s6, %s649_s4 }
  0x1e   : > { %307 = vmatprep.subr.bf16.mxu0 %v641_v4  ;;  %577 = vmatprep.subr.bf16.mxu1 %v641_v4  ;;  %v417_v32 = vrot.slane %v348_v15, %v416_v22  ;;  %v421_v35 = vrot.slane %v348_v15, %v420_v23  ;;  %v405_v36 = vrot.slane %v395_v24, %v394_v16 }
  0x1f   : > { %v367_v37 = vrot.slane %v357_v25, %v352_v13  ;;  %v387_v38 = vrot.slane %v377_v26, %v372_v14  ;;  %v409_v42 = vrot.slane %v399_v30, %v394_v16  ;;  %p658_p3 = por %p657_p2, %p656_p1 }
  0x20   : > { %v427_v44 = vrot.slane %v417_v32, %v416_v22  ;;  %v431_v46 = vrot.slane %v421_v35, %v416_v22 }
  0x21   : > { %308 = vmatpush1.bf16.msra.mxu0 %v643_v6  ;;  %580 = vmatpush1.bf16.msra.mxu1 %v643_v6  ;;  %p659_p5 = pnand %p658_p3, %p652_p0 }
  0x22   : > { %309 = vmatprep.subr.bf16.mxu0 %v644_v7  ;;  %578 = vmatprep.subr.bf16.mxu1 %v644_v7 }
  0x25   : > { %310 = vmatpush1.bf16.msra.mxu0 %v646_v8  ;;  %581 = vmatpush1.bf16.msra.mxu1 %v646_v8 }
  0x28   : > { %567 = vmatmul.mubr.msk.bf16.vlgmr.msra.gmra.mxu0 %vm281_vm1, %v647_v9  ;;  %568 = vmatmul.mubr.msk.bf16.vlgmr.msra.gmra.mxu1 %vm281_vm1, %v648_v10 }
  0xe8   : > { %v329_v27 = vpop.f32.mrf.mxu0  ;;  %v339_v28 = vpop.f32.mrf.mxu1 }
  0xe9   : > { %v368_v41 = vmul.f32 %v363_v29, %v329_v27  ;;  %v410_v47 = vmul.f32 %v405_v36, %v339_v28 }
  0xea   : > { %v331_v33 = vpop.f32.mrf.mxu0  ;;  %v341_v34 = vpop.f32.mrf.mxu1 }
  0xeb   : > { %v369_v48 = vmul.f32 %v367_v37, %v331_v33  ;;  %v411_v52 = vmul.f32 %v409_v42, %v341_v34 }
  0xec   : > { %v333_v39 = vpop.f32.mrf.mxu0  ;;  %v343_v40 = vpop.f32.mrf.mxu1 }
  0xed   : > { %v388_v43 = vmul.f32 %v383_v31, %v333_v39  ;;  %v432_v54 = vmul.f32 %v427_v44, %v343_v40 }
  0xee   : > { %v335_v45 = vpop.f32.mrf.mxu0  ;;  %v345_v51 = vpop.f32.mrf.mxu1 }
  0xef   : > { %v390_v49 = vadd.f32 %v388_v43, %v368_v41  ;;  %v389_v50 = vmul.f32 %v387_v38, %v335_v45  ;;  %v433_v58 = vmul.f32 %v431_v46, %v345_v51 }
  0xf1   : > { %v412_v53 = vadd.f32 %v410_v47, %v390_v49  ;;  %v391_v55 = vadd.f32 %v389_v50, %v369_v48 }
  0xf3   : > { %v434_v56 = vadd.f32 %v432_v54, %v412_v53  ;;  %v413_v57 = vadd.f32 %v411_v52, %v391_v55 }
  0xf5   : > { %436 = vst [vmem:[%s214_s23] sm:$0xff] %v434_v56  ;;  %v435_v59 = vadd.f32 %v433_v58, %v413_v57 }
  0xf7   : > { %437 = vst [vmem:[%s214_s23 + $0x8] sm:$0xff] %v435_v59 }
  0xf8   : > { %662 = shalt.err (!%p659_p5)
}
  0xf9   : > { %s663_s7 = scalar_lea.hbm %s453_s29, 256  ;;  %s667_s10 = scalar_lea.hbm %s868_s3, 512 }
  0xfa   : > { %p664_p6 = scmp.ne.s32.totalorder %s453_s29, %s663_s7  ;;  %p668_p10 = scmp.lt.s32.totalorder %s453_s29, %s868_s3 }
  0xfb   : > { %p669_p11 = scmp.lt.s32.totalorder %s667_s10, %s663_s7 }
  0xfc   : > { %p665_p7 = pnand %p664_p6, %p789_p4 }
  0xfd   : > { %p670_p12 = por %p669_p11, %p668_p10 }
  0xfe   : > { %p666_p9 = pneg %p665_p7 }
 0x100   : > { %p671_p13 = pnand %p670_p12, %p666_p9 }
 0x102   : > { %674 = shalt.err (!%p671_p13)
}
 0x103   : > { %583 = dma.vmem_to_hbm [thread:$0]  (%p789_p4), %s456_s26, 256, %s453_s29, %s439_s30  }
 0x104 PF: > { %p589_p0 = scmp.ge.s32.totalorder %s725_s17, 2  ;;  %s467_s19 = sand.u32 1, %s705_s12  }
 0x105   : > { %s468_s21 = scalar_lea.sflag [#allocation3], %s467_s19 }
 0x106   : > { %p586_p1 = pnand %p589_p0, %p796_p8 }
 0x108   : > { %p587_p2 = pneg %p586_p1 }
 0x10a   : > { %700 = dma.done.wait (%p587_p2), %s468_s21, 256  }
 0x10b   : > { %702 = vsyncadd (%p587_p2), %s468_s21, 4294967040  ;;  %s16_s17 = sadd.s32 1, %s725_s17   ;;  %s871_s12 = smov %s709_s13 }
 0x10c   : > { %p13_p3 = scmp.ge.s32.totalorder %s16_s17, 4   ;;  %s872_s13 = smov %s713_s14 }
 0x10d   : > { %s873_s14 = smov %s802_s25  ;;  %s874_s15 = smov %s721_s16 }
 0x10e   : > { %s875_s16 = smov %s877_s20  ;;  %15 = sbr.rel (!%p13_p3) target bundleno = 4 (0x4), region = 70 }
 0x113   :  { %473 = vsyncpa [#allocation3], 1 }
 0x114   :  { %475 = vsyncpa [#allocation3 + $0x1], 1 }

</bundles_post_ra>
